<compile_context>
chip_gen: v7x
topology: tpu7x:2x2x1
jax: 0.10.0
libtpu: 0.0.40
codegen_flags: <defaults>
</compile_context>

<pallas_src>
import functools

import jax
import jax.numpy as jnp
import numpy as np
from jax import lax
from jax.experimental import pallas as pl
from jax.experimental.pallas import tpu as pltpu


# ----------------------------------------------------------------------------
# Fused LSTM + output-Linear kernel (single invocation, no grid).
# ----------------------------------------------------------------------------
def lstm_fused_kernel(x_ref, h0_ref, c0_ref, wih_ref, whh_ref, b_ref, wout_ref,
                      y_ref, hn_ref, cn_ref,
                      xg_sc, hall_sc,
                      *, seq_len: int, batch: int, hidden: int):
    B, H = batch, hidden

    # ---- Phase 1: batched input projection (+ fused bias) for all timesteps --
    # (T*B, D) @ (D, 4H) -> one MXU pass instead of T tiny ones.
    xg_sc[...] = (jnp.dot(x_ref[...], wih_ref[...],
                          preferred_element_type=jnp.float32)
                  + b_ref[...])

    whh = whh_ref[...]          # hoisted: loaded once, reused every step

    # ---- Phase 2: sequential recurrence (the only truly serial part) --------
    def step(t, carry):
        h, c = carry
        row = pl.multiple_of(t * B, B)
        gates = xg_sc[pl.ds(row, B), :] + jnp.dot(
            h, whh, preferred_element_type=jnp.float32)          # (B, 4H)

        # PyTorch gate order: input, forget, cell(g), output.
        i_g = jax.nn.sigmoid(gates[:, 0 * H:1 * H])
        f_g = jax.nn.sigmoid(gates[:, 1 * H:2 * H])
        g_g = jnp.tanh(gates[:, 2 * H:3 * H])
        o_g = jax.nn.sigmoid(gates[:, 3 * H:4 * H])

        c_new = f_g * c + i_g * g_g
        h_new = o_g * jnp.tanh(c_new)

        hall_sc[pl.ds(row, B), :] = h_new                        # keep h_t
        return h_new, c_new

    h_fin, c_fin = lax.fori_loop(
        0, seq_len, step, (h0_ref[...], c0_ref[...]),
        unroll=(seq_len <= 16))

    # ---- Phase 3: single output projection + single writebacks --------------
    y_ref[...] = jnp.dot(hall_sc[...], wout_ref[...],
                         preferred_element_type=jnp.float32).astype(y_ref.dtype)
    hn_ref[...] = h_fin.astype(hn_ref.dtype)
    cn_ref[...] = c_fin.astype(cn_ref.dtype)


def transition_model_forward(inp, params, hx=None):
    """inp: (T, B, D) f32.  Returns (y, (h_n, c_n)) like the PyTorch module."""
    T, B, D = inp.shape
    wih, whh, b, wout = params["wih"], params["whh"], params["b"], params["wout"]
    H = whh.shape[0]
    O = wout.shape[1]

    if hx is None:
        h0 = jnp.zeros((1, B, H), jnp.float32)
        c0 = jnp.zeros((1, B, H), jnp.float32)
    else:
        h0, c0 = hx

    # Free layout change outside the kernel: present (T*B, D) so the kernel's
    # input projection is one big 2-D matmul (no in-kernel reshapes needed).
    x2 = inp.reshape(T * B, D)

    vmem = pl.BlockSpec(memory_space=pltpu.MemorySpace.VMEM)
    kernel = functools.partial(lstm_fused_kernel, seq_len=T, batch=B, hidden=H)

    y2, hn, cn = pl.pallas_call(
        kernel,
        out_shape=(
            jax.ShapeDtypeStruct((T * B, O), jnp.float32),   # y (flattened)
            jax.ShapeDtypeStruct((B, H), jnp.float32),       # h_n
            jax.ShapeDtypeStruct((B, H), jnp.float32),       # c_n
        ),
        in_specs=[vmem] * 7,
        out_specs=(vmem, vmem, vmem),
        scratch_shapes=[
            pltpu.VMEM((T * B, 4 * H), jnp.float32),         # precomputed x-gates
            pltpu.VMEM((T * B, H), jnp.float32),             # all hidden states
        ],
    )(x2, h0[0], c0[0], wih, whh, b, wout)

    return y2.reshape(T, B, O), (hn[None], cn[None])


# ----------------------------------------------------------------------------
# Deterministic parameter init (PyTorch-style uniform(-1/sqrt(H), 1/sqrt(H))).
# ----------------------------------------------------------------------------
def init_params(key, input_dim, hidden_dim, output_dim):
    k = 1.0 / np.sqrt(hidden_dim)
    k1, k2, k3, k4, k5 = jax.random.split(key, 5)
    w_ih = jax.random.uniform(k1, (4 * hidden_dim, input_dim), jnp.float32, -k, k)
    w_hh = jax.random.uniform(k2, (4 * hidden_dim, hidden_dim), jnp.float32, -k, k)
    b_ih = jax.random.uniform(k3, (4 * hidden_dim,), jnp.float32, -k, k)
    b_hh = jax.random.uniform(k4, (4 * hidden_dim,), jnp.float32, -k, k)
    w_out = jax.random.uniform(k5, (output_dim, hidden_dim), jnp.float32, -k, k)
    return {
        "wih": w_ih.T,                              # (D, 4H)
        "whh": w_hh.T,                              # (H, 4H)
        "b": (b_ih + b_hh).reshape(1, 4 * hidden_dim),
        "wout": w_out.T,                            # (H, O)
    }


# Pure-JAX reference (lax.scan) for correctness checking.
def reference_forward(inp, params, hx=None):
    T, B, D = inp.shape
    H = params["whh"].shape[0]
    if hx is None:
        h0 = jnp.zeros((B, H), jnp.float32)
        c0 = jnp.zeros((B, H), jnp.float32)
    else:
        h0, c0 = hx[0][0], hx[1][0]

    def step(carry, x):
        h, c = carry
        gates = x @ params["wih"] + h @ params["whh"] + params["b"][0]
        i = jax.nn.sigmoid(gates[:, 0 * H:1 * H])
        f = jax.nn.sigmoid(gates[:, 1 * H:2 * H])
        g = jnp.tanh(gates[:, 2 * H:3 * H])
        o = jax.nn.sigmoid(gates[:, 3 * H:4 * H])
        c_new = f * c + i * g
        h_new = o * jnp.tanh(c_new)
        return (h_new, c_new), h_new @ params["wout"]

    (h_n, c_n), y = lax.scan(step, (h0, c0), inp)
    return y, (h_n[None], c_n[None])


if __name__ == "__main__":
    T, B, D, H, O = 8, 2, 4, 32, 4   # seq=8, batch=2, input=4, hidden=32, output=4

    key = jax.random.PRNGKey(0)
    kp, kx = jax.random.split(key)
    params = init_params(kp, D, H, O)
    inp = jax.random.normal(kx, (T, B, D), jnp.float32)

    y, (h_n, c_n) = transition_model_forward(inp, params)
    jax.block_until_ready((y, h_n, c_n))

    y_ref, (h_ref, c_ref) = reference_forward(inp, params)
    np.testing.assert_allclose(np.asarray(y), np.asarray(y_ref), rtol=1e-4, atol=1e-4)
    np.testing.assert_allclose(np.asarray(h_n), np.asarray(h_ref), rtol=1e-4, atol=1e-4)
    np.testing.assert_allclose(np.asarray(c_n), np.asarray(c_ref), rtol=1e-4, atol=1e-4)

    print("KERNEL_OK")
</pallas_src>

<mosaic_0001>
module attributes {stable_mosaic.version = 11 : i64} {
  func.func @lstm_fused_kernel(%arg0: memref<16x4xf32, #tpu.memory_space<vmem>>, %arg1: memref<2x32xf32, #tpu.memory_space<vmem>>, %arg2: memref<2x32xf32, #tpu.memory_space<vmem>>, %arg3: memref<4x128xf32, #tpu.memory_space<vmem>>, %arg4: memref<32x128xf32, #tpu.memory_space<vmem>>, %arg5: memref<1x128xf32, #tpu.memory_space<vmem>>, %arg6: memref<32x4xf32, #tpu.memory_space<vmem>>, %arg7: memref<16x4xf32, #tpu.memory_space<vmem>>, %arg8: memref<2x32xf32, #tpu.memory_space<vmem>>, %arg9: memref<2x32xf32, #tpu.memory_space<vmem>>, %arg10: memref<16x128xf32, #tpu.memory_space<vmem>>, %arg11: memref<16x32xf32, #tpu.memory_space<vmem>>) attributes {dimension_semantics = [], scalar_prefetch = 0 : i64, scratch_operands = 2 : i64, tpu.core_type = #tpu.core_type<tc>} {
    %c0 = arith.constant 0 : index
    %c0_0 = arith.constant 0 : index
    %0 = vector.load %arg0[%c0, %c0_0] : memref<16x4xf32, #tpu.memory_space<vmem>>, vector<16x4xf32>
    %c0_1 = arith.constant 0 : index
    %c0_2 = arith.constant 0 : index
    %1 = vector.load %arg3[%c0_1, %c0_2] : memref<4x128xf32, #tpu.memory_space<vmem>>, vector<4x128xf32>
    %cst = arith.constant dense<0.000000e+00> : vector<16x128xf32>
    %2 = tpu.matmul %0, %1, %cst {dimension_numbers = #tpu.dot_dimension_numbers<[1], [0], [0], [1], [0, 0, 1, 1], [], []>} : vector<16x4xf32>, vector<4x128xf32>, vector<16x128xf32> -> vector<16x128xf32>
    %c0_3 = arith.constant 0 : index
    %c0_4 = arith.constant 0 : index
    %3 = vector.load %arg5[%c0_3, %c0_4] : memref<1x128xf32, #tpu.memory_space<vmem>>, vector<1x128xf32>
    %4 = vector.broadcast %3 : vector<1x128xf32> to vector<16x128xf32>
    %5 = arith.addf %2, %4 : vector<16x128xf32>
    %c0_5 = arith.constant 0 : index
    %c0_6 = arith.constant 0 : index
    %6 = vector.load %arg10[%c0_5, %c0_6] : memref<16x128xf32, #tpu.memory_space<vmem>>, vector<16x128xf32>
    tpu.vector_store %arg10[%c0_5, %c0_6], %5 {strides = array<i32>} : memref<16x128xf32, #tpu.memory_space<vmem>>, vector<16x128xf32>,
    %c0_7 = arith.constant 0 : index
    %c0_8 = arith.constant 0 : index
    %7 = vector.load %arg4[%c0_7, %c0_8] : memref<32x128xf32, #tpu.memory_space<vmem>>, vector<32x128xf32>
    %c0_9 = arith.constant 0 : index
    %c0_10 = arith.constant 0 : index
    %8 = vector.load %arg1[%c0_9, %c0_10] : memref<2x32xf32, #tpu.memory_space<vmem>>, vector<2x32xf32>
    %c0_11 = arith.constant 0 : index
    %c0_12 = arith.constant 0 : index
    %9 = vector.load %arg2[%c0_11, %c0_12] : memref<2x32xf32, #tpu.memory_space<vmem>>, vector<2x32xf32>
    %c0_i32 = arith.constant 0 : i32
    %c2_i32 = arith.constant 2 : i32
    %10 = arith.muli %c0_i32, %c2_i32 : i32
    %11 = tpu.assume_multiple %10, 2 : i32
    %12 = arith.index_cast %11 : i32 to index
    %c0_13 = arith.constant 0 : index
    %13 = vector.load %arg10[%12, %c0_13] : memref<16x128xf32, #tpu.memory_space<vmem>>, vector<2x128xf32>
    %cst_14 = arith.constant dense<0.000000e+00> : vector<2x128xf32>
    %14 = tpu.matmul %8, %7, %cst_14 {dimension_numbers = #tpu.dot_dimension_numbers<[1], [0], [0], [1], [0, 0, 1, 1], [], []>} : vector<2x32xf32>, vector<32x128xf32>, vector<2x128xf32> -> vector<2x128xf32>
    %15 = arith.addf %13, %14 : vector<2x128xf32>
    %16 = vector.extract_strided_slice %15 {offsets = [0, 0], sizes = [2, 32], strides = [1, 1]} : vector<2x128xf32> to vector<2x32xf32>
    %17 = arith.negf %16 : vector<2x32xf32>
    %18 = math.exp %17 : vector<2x32xf32>
    %cst_15 = arith.constant 1.000000e+00 : f32
    %19 = vector.broadcast %cst_15 : f32 to vector<2x32xf32>
    %20 = arith.addf %19, %18 : vector<2x32xf32>
    %21 = arith.divf %19, %20 : vector<2x32xf32>
    %22 = vector.extract_strided_slice %15 {offsets = [0, 32], sizes = [2, 32], strides = [1, 1]} : vector<2x128xf32> to vector<2x32xf32>
    %23 = arith.negf %22 : vector<2x32xf32>
    %24 = math.exp %23 : vector<2x32xf32>
    %cst_16 = arith.constant 1.000000e+00 : f32
    %25 = vector.broadcast %cst_16 : f32 to vector<2x32xf32>
    %26 = arith.addf %25, %24 : vector<2x32xf32>
    %27 = arith.divf %25, %26 : vector<2x32xf32>
    %28 = vector.extract_strided_slice %15 {offsets = [0, 64], sizes = [2, 32], strides = [1, 1]} : vector<2x128xf32> to vector<2x32xf32>
    %29 = math.tanh %28 : vector<2x32xf32>
    %30 = vector.extract_strided_slice %15 {offsets = [0, 96], sizes = [2, 32], strides = [1, 1]} : vector<2x128xf32> to vector<2x32xf32>
    %31 = arith.negf %30 : vector<2x32xf32>
    %32 = math.exp %31 : vector<2x32xf32>
    %cst_17 = arith.constant 1.000000e+00 : f32
    %33 = vector.broadcast %cst_17 : f32 to vector<2x32xf32>
    %34 = arith.addf %33, %32 : vector<2x32xf32>
    %35 = arith.divf %33, %34 : vector<2x32xf32>
    %36 = arith.mulf %27, %9 : vector<2x32xf32>
    %37 = arith.mulf %21, %29 : vector<2x32xf32>
    %38 = arith.addf %36, %37 : vector<2x32xf32>
    %39 = math.tanh %38 : vector<2x32xf32>
    %40 = arith.mulf %35, %39 : vector<2x32xf32>
    %41 = arith.index_cast %11 : i32 to index
    %c0_18 = arith.constant 0 : index
    %42 = vector.load %arg11[%41, %c0_18] : memref<16x32xf32, #tpu.memory_space<vmem>>, vector<2x32xf32>
    tpu.vector_store %arg11[%41, %c0_18], %40 {strides = array<i32>} : memref<16x32xf32, #tpu.memory_space<vmem>>, vector<2x32xf32>,
    %c1_i32 = arith.constant 1 : i32
    %c2_i32_19 = arith.constant 2 : i32
    %43 = arith.muli %c1_i32, %c2_i32_19 : i32
    %44 = tpu.assume_multiple %43, 2 : i32
    %45 = arith.index_cast %44 : i32 to index
    %c0_20 = arith.constant 0 : index
    %46 = vector.load %arg10[%45, %c0_20] : memref<16x128xf32, #tpu.memory_space<vmem>>, vector<2x128xf32>
    %cst_21 = arith.constant dense<0.000000e+00> : vector<2x128xf32>
    %47 = tpu.matmul %40, %7, %cst_21 {dimension_numbers = #tpu.dot_dimension_numbers<[1], [0], [0], [1], [0, 0, 1, 1], [], []>} : vector<2x32xf32>, vector<32x128xf32>, vector<2x128xf32> -> vector<2x128xf32>
    %48 = arith.addf %46, %47 : vector<2x128xf32>
    %49 = vector.extract_strided_slice %48 {offsets = [0, 0], sizes = [2, 32], strides = [1, 1]} : vector<2x128xf32> to vector<2x32xf32>
    %50 = arith.negf %49 : vector<2x32xf32>
    %51 = math.exp %50 : vector<2x32xf32>
    %cst_22 = arith.constant 1.000000e+00 : f32
    %52 = vector.broadcast %cst_22 : f32 to vector<2x32xf32>
    %53 = arith.addf %52, %51 : vector<2x32xf32>
    %54 = arith.divf %52, %53 : vector<2x32xf32>
    %55 = vector.extract_strided_slice %48 {offsets = [0, 32], sizes = [2, 32], strides = [1, 1]} : vector<2x128xf32> to vector<2x32xf32>
    %56 = arith.negf %55 : vector<2x32xf32>
    %57 = math.exp %56 : vector<2x32xf32>
    %cst_23 = arith.constant 1.000000e+00 : f32
    %58 = vector.broadcast %cst_23 : f32 to vector<2x32xf32>
    %59 = arith.addf %58, %57 : vector<2x32xf32>
    %60 = arith.divf %58, %59 : vector<2x32xf32>
    %61 = vector.extract_strided_slice %48 {offsets = [0, 64], sizes = [2, 32], strides = [1, 1]} : vector<2x128xf32> to vector<2x32xf32>
    %62 = math.tanh %61 : vector<2x32xf32>
    %63 = vector.extract_strided_slice %48 {offsets = [0, 96], sizes = [2, 32], strides = [1, 1]} : vector<2x128xf32> to vector<2x32xf32>
    %64 = arith.negf %63 : vector<2x32xf32>
    %65 = math.exp %64 : vector<2x32xf32>
    %cst_24 = arith.constant 1.000000e+00 : f32
    %66 = vector.broadcast %cst_24 : f32 to vector<2x32xf32>
    %67 = arith.addf %66, %65 : vector<2x32xf32>
    %68 = arith.divf %66, %67 : vector<2x32xf32>
    %69 = arith.mulf %60, %38 : vector<2x32xf32>
    %70 = arith.mulf %54, %62 : vector<2x32xf32>
    %71 = arith.addf %69, %70 : vector<2x32xf32>
    %72 = math.tanh %71 : vector<2x32xf32>
    %73 = arith.mulf %68, %72 : vector<2x32xf32>
    %74 = arith.index_cast %44 : i32 to index
    %c0_25 = arith.constant 0 : index
    %75 = vector.load %arg11[%74, %c0_25] : memref<16x32xf32, #tpu.memory_space<vmem>>, vector<2x32xf32>
    tpu.vector_store %arg11[%74, %c0_25], %73 {strides = array<i32>} : memref<16x32xf32, #tpu.memory_space<vmem>>, vector<2x32xf32>,
    %c2_i32_26 = arith.constant 2 : i32
    %c2_i32_27 = arith.constant 2 : i32
    %76 = arith.muli %c2_i32_26, %c2_i32_27 : i32
    %77 = tpu.assume_multiple %76, 2 : i32
    %78 = arith.index_cast %77 : i32 to index
    %c0_28 = arith.constant 0 : index
    %79 = vector.load %arg10[%78, %c0_28] : memref<16x128xf32, #tpu.memory_space<vmem>>, vector<2x128xf32>
    %cst_29 = arith.constant dense<0.000000e+00> : vector<2x128xf32>
    %80 = tpu.matmul %73, %7, %cst_29 {dimension_numbers = #tpu.dot_dimension_numbers<[1], [0], [0], [1], [0, 0, 1, 1], [], []>} : vector<2x32xf32>, vector<32x128xf32>, vector<2x128xf32> -> vector<2x128xf32>
    %81 = arith.addf %79, %80 : vector<2x128xf32>
    %82 = vector.extract_strided_slice %81 {offsets = [0, 0], sizes = [2, 32], strides = [1, 1]} : vector<2x128xf32> to vector<2x32xf32>
    %83 = arith.negf %82 : vector<2x32xf32>
    %84 = math.exp %83 : vector<2x32xf32>
    %cst_30 = arith.constant 1.000000e+00 : f32
    %85 = vector.broadcast %cst_30 : f32 to vector<2x32xf32>
    %86 = arith.addf %85, %84 : vector<2x32xf32>
    %87 = arith.divf %85, %86 : vector<2x32xf32>
    %88 = vector.extract_strided_slice %81 {offsets = [0, 32], sizes = [2, 32], strides = [1, 1]} : vector<2x128xf32> to vector<2x32xf32>
    %89 = arith.negf %88 : vector<2x32xf32>
    %90 = math.exp %89 : vector<2x32xf32>
    %cst_31 = arith.constant 1.000000e+00 : f32
    %91 = vector.broadcast %cst_31 : f32 to vector<2x32xf32>
    %92 = arith.addf %91, %90 : vector<2x32xf32>
    %93 = arith.divf %91, %92 : vector<2x32xf32>
    %94 = vector.extract_strided_slice %81 {offsets = [0, 64], sizes = [2, 32], strides = [1, 1]} : vector<2x128xf32> to vector<2x32xf32>
    %95 = math.tanh %94 : vector<2x32xf32>
    %96 = vector.extract_strided_slice %81 {offsets = [0, 96], sizes = [2, 32], strides = [1, 1]} : vector<2x128xf32> to vector<2x32xf32>
    %97 = arith.negf %96 : vector<2x32xf32>
    %98 = math.exp %97 : vector<2x32xf32>
    %cst_32 = arith.constant 1.000000e+00 : f32
    %99 = vector.broadcast %cst_32 : f32 to vector<2x32xf32>
    %100 = arith.addf %99, %98 : vector<2x32xf32>
    %101 = arith.divf %99, %100 : vector<2x32xf32>
    %102 = arith.mulf %93, %71 : vector<2x32xf32>
    %103 = arith.mulf %87, %95 : vector<2x32xf32>
    %104 = arith.addf %102, %103 : vector<2x32xf32>
    %105 = math.tanh %104 : vector<2x32xf32>
    %106 = arith.mulf %101, %105 : vector<2x32xf32>
    %107 = arith.index_cast %77 : i32 to index
    %c0_33 = arith.constant 0 : index
    %108 = vector.load %arg11[%107, %c0_33] : memref<16x32xf32, #tpu.memory_space<vmem>>, vector<2x32xf32>
    tpu.vector_store %arg11[%107, %c0_33], %106 {strides = array<i32>} : memref<16x32xf32, #tpu.memory_space<vmem>>, vector<2x32xf32>,
    %c3_i32 = arith.constant 3 : i32
    %c2_i32_34 = arith.constant 2 : i32
    %109 = arith.muli %c3_i32, %c2_i32_34 : i32
    %110 = tpu.assume_multiple %109, 2 : i32
    %111 = arith.index_cast %110 : i32 to index
    %c0_35 = arith.constant 0 : index
    %112 = vector.load %arg10[%111, %c0_35] : memref<16x128xf32, #tpu.memory_space<vmem>>, vector<2x128xf32>
    %cst_36 = arith.constant dense<0.000000e+00> : vector<2x128xf32>
    %113 = tpu.matmul %106, %7, %cst_36 {dimension_numbers = #tpu.dot_dimension_numbers<[1], [0], [0], [1], [0, 0, 1, 1], [], []>} : vector<2x32xf32>, vector<32x128xf32>, vector<2x128xf32> -> vector<2x128xf32>
    %114 = arith.addf %112, %113 : vector<2x128xf32>
    %115 = vector.extract_strided_slice %114 {offsets = [0, 0], sizes = [2, 32], strides = [1, 1]} : vector<2x128xf32> to vector<2x32xf32>
    %116 = arith.negf %115 : vector<2x32xf32>
    %117 = math.exp %116 : vector<2x32xf32>
    %cst_37 = arith.constant 1.000000e+00 : f32
    %118 = vector.broadcast %cst_37 : f32 to vector<2x32xf32>
    %119 = arith.addf %118, %117 : vector<2x32xf32>
    %120 = arith.divf %118, %119 : vector<2x32xf32>
    %121 = vector.extract_strided_slice %114 {offsets = [0, 32], sizes = [2, 32], strides = [1, 1]} : vector<2x128xf32> to vector<2x32xf32>
    %122 = arith.negf %121 : vector<2x32xf32>
    %123 = math.exp %122 : vector<2x32xf32>
    %cst_38 = arith.constant 1.000000e+00 : f32
    %124 = vector.broadcast %cst_38 : f32 to vector<2x32xf32>
    %125 = arith.addf %124, %123 : vector<2x32xf32>
    %126 = arith.divf %124, %125 : vector<2x32xf32>
    %127 = vector.extract_strided_slice %114 {offsets = [0, 64], sizes = [2, 32], strides = [1, 1]} : vector<2x128xf32> to vector<2x32xf32>
    %128 = math.tanh %127 : vector<2x32xf32>
    %129 = vector.extract_strided_slice %114 {offsets = [0, 96], sizes = [2, 32], strides = [1, 1]} : vector<2x128xf32> to vector<2x32xf32>
    %130 = arith.negf %129 : vector<2x32xf32>
    %131 = math.exp %130 : vector<2x32xf32>
    %cst_39 = arith.constant 1.000000e+00 : f32
    %132 = vector.broadcast %cst_39 : f32 to vector<2x32xf32>
    %133 = arith.addf %132, %131 : vector<2x32xf32>
    %134 = arith.divf %132, %133 : vector<2x32xf32>
    %135 = arith.mulf %126, %104 : vector<2x32xf32>
    %136 = arith.mulf %120, %128 : vector<2x32xf32>
    %137 = arith.addf %135, %136 : vector<2x32xf32>
    %138 = math.tanh %137 : vector<2x32xf32>
    %139 = arith.mulf %134, %138 : vector<2x32xf32>
    %140 = arith.index_cast %110 : i32 to index
    %c0_40 = arith.constant 0 : index
    %141 = vector.load %arg11[%140, %c0_40] : memref<16x32xf32, #tpu.memory_space<vmem>>, vector<2x32xf32>
    tpu.vector_store %arg11[%140, %c0_40], %139 {strides = array<i32>} : memref<16x32xf32, #tpu.memory_space<vmem>>, vector<2x32xf32>,
    %c4_i32 = arith.constant 4 : i32
    %c2_i32_41 = arith.constant 2 : i32
    %142 = arith.muli %c4_i32, %c2_i32_41 : i32
    %143 = tpu.assume_multiple %142, 2 : i32
    %144 = arith.index_cast %143 : i32 to index
    %c0_42 = arith.constant 0 : index
    %145 = vector.load %arg10[%144, %c0_42] : memref<16x128xf32, #tpu.memory_space<vmem>>, vector<2x128xf32>
    %cst_43 = arith.constant dense<0.000000e+00> : vector<2x128xf32>
    %146 = tpu.matmul %139, %7, %cst_43 {dimension_numbers = #tpu.dot_dimension_numbers<[1], [0], [0], [1], [0, 0, 1, 1], [], []>} : vector<2x32xf32>, vector<32x128xf32>, vector<2x128xf32> -> vector<2x128xf32>
    %147 = arith.addf %145, %146 : vector<2x128xf32>
    %148 = vector.extract_strided_slice %147 {offsets = [0, 0], sizes = [2, 32], strides = [1, 1]} : vector<2x128xf32> to vector<2x32xf32>
    %149 = arith.negf %148 : vector<2x32xf32>
    %150 = math.exp %149 : vector<2x32xf32>
    %cst_44 = arith.constant 1.000000e+00 : f32
    %151 = vector.broadcast %cst_44 : f32 to vector<2x32xf32>
    %152 = arith.addf %151, %150 : vector<2x32xf32>
    %153 = arith.divf %151, %152 : vector<2x32xf32>
    %154 = vector.extract_strided_slice %147 {offsets = [0, 32], sizes = [2, 32], strides = [1, 1]} : vector<2x128xf32> to vector<2x32xf32>
    %155 = arith.negf %154 : vector<2x32xf32>
    %156 = math.exp %155 : vector<2x32xf32>
    %cst_45 = arith.constant 1.000000e+00 : f32
    %157 = vector.broadcast %cst_45 : f32 to vector<2x32xf32>
    %158 = arith.addf %157, %156 : vector<2x32xf32>
    %159 = arith.divf %157, %158 : vector<2x32xf32>
    %160 = vector.extract_strided_slice %147 {offsets = [0, 64], sizes = [2, 32], strides = [1, 1]} : vector<2x128xf32> to vector<2x32xf32>
    %161 = math.tanh %160 : vector<2x32xf32>
    %162 = vector.extract_strided_slice %147 {offsets = [0, 96], sizes = [2, 32], strides = [1, 1]} : vector<2x128xf32> to vector<2x32xf32>
    %163 = arith.negf %162 : vector<2x32xf32>
    %164 = math.exp %163 : vector<2x32xf32>
    %cst_46 = arith.constant 1.000000e+00 : f32
    %165 = vector.broadcast %cst_46 : f32 to vector<2x32xf32>
    %166 = arith.addf %165, %164 : vector<2x32xf32>
    %167 = arith.divf %165, %166 : vector<2x32xf32>
    %168 = arith.mulf %159, %137 : vector<2x32xf32>
    %169 = arith.mulf %153, %161 : vector<2x32xf32>
    %170 = arith.addf %168, %169 : vector<2x32xf32>
    %171 = math.tanh %170 : vector<2x32xf32>
    %172 = arith.mulf %167, %171 : vector<2x32xf32>
    %173 = arith.index_cast %143 : i32 to index
    %c0_47 = arith.constant 0 : index
    %174 = vector.load %arg11[%173, %c0_47] : memref<16x32xf32, #tpu.memory_space<vmem>>, vector<2x32xf32>
    tpu.vector_store %arg11[%173, %c0_47], %172 {strides = array<i32>} : memref<16x32xf32, #tpu.memory_space<vmem>>, vector<2x32xf32>,
    %c5_i32 = arith.constant 5 : i32
    %c2_i32_48 = arith.constant 2 : i32
    %175 = arith.muli %c5_i32, %c2_i32_48 : i32
    %176 = tpu.assume_multiple %175, 2 : i32
    %177 = arith.index_cast %176 : i32 to index
    %c0_49 = arith.constant 0 : index
    %178 = vector.load %arg10[%177, %c0_49] : memref<16x128xf32, #tpu.memory_space<vmem>>, vector<2x128xf32>
    %cst_50 = arith.constant dense<0.000000e+00> : vector<2x128xf32>
    %179 = tpu.matmul %172, %7, %cst_50 {dimension_numbers = #tpu.dot_dimension_numbers<[1], [0], [0], [1], [0, 0, 1, 1], [], []>} : vector<2x32xf32>, vector<32x128xf32>, vector<2x128xf32> -> vector<2x128xf32>
    %180 = arith.addf %178, %179 : vector<2x128xf32>
    %181 = vector.extract_strided_slice %180 {offsets = [0, 0], sizes = [2, 32], strides = [1, 1]} : vector<2x128xf32> to vector<2x32xf32>
    %182 = arith.negf %181 : vector<2x32xf32>
    %183 = math.exp %182 : vector<2x32xf32>
    %cst_51 = arith.constant 1.000000e+00 : f32
    %184 = vector.broadcast %cst_51 : f32 to vector<2x32xf32>
    %185 = arith.addf %184, %183 : vector<2x32xf32>
    %186 = arith.divf %184, %185 : vector<2x32xf32>
    %187 = vector.extract_strided_slice %180 {offsets = [0, 32], sizes = [2, 32], strides = [1, 1]} : vector<2x128xf32> to vector<2x32xf32>
    %188 = arith.negf %187 : vector<2x32xf32>
    %189 = math.exp %188 : vector<2x32xf32>
    %cst_52 = arith.constant 1.000000e+00 : f32
    %190 = vector.broadcast %cst_52 : f32 to vector<2x32xf32>
    %191 = arith.addf %190, %189 : vector<2x32xf32>
    %192 = arith.divf %190, %191 : vector<2x32xf32>
    %193 = vector.extract_strided_slice %180 {offsets = [0, 64], sizes = [2, 32], strides = [1, 1]} : vector<2x128xf32> to vector<2x32xf32>
    %194 = math.tanh %193 : vector<2x32xf32>
    %195 = vector.extract_strided_slice %180 {offsets = [0, 96], sizes = [2, 32], strides = [1, 1]} : vector<2x128xf32> to vector<2x32xf32>
    %196 = arith.negf %195 : vector<2x32xf32>
    %197 = math.exp %196 : vector<2x32xf32>
    %cst_53 = arith.constant 1.000000e+00 : f32
    %198 = vector.broadcast %cst_53 : f32 to vector<2x32xf32>
    %199 = arith.addf %198, %197 : vector<2x32xf32>
    %200 = arith.divf %198, %199 : vector<2x32xf32>
    %201 = arith.mulf %192, %170 : vector<2x32xf32>
    %202 = arith.mulf %186, %194 : vector<2x32xf32>
    %203 = arith.addf %201, %202 : vector<2x32xf32>
    %204 = math.tanh %203 : vector<2x32xf32>
    %205 = arith.mulf %200, %204 : vector<2x32xf32>
    %206 = arith.index_cast %176 : i32 to index
    %c0_54 = arith.constant 0 : index
    %207 = vector.load %arg11[%206, %c0_54] : memref<16x32xf32, #tpu.memory_space<vmem>>, vector<2x32xf32>
    tpu.vector_store %arg11[%206, %c0_54], %205 {strides = array<i32>} : memref<16x32xf32, #tpu.memory_space<vmem>>, vector<2x32xf32>,
    %c6_i32 = arith.constant 6 : i32
    %c2_i32_55 = arith.constant 2 : i32
    %208 = arith.muli %c6_i32, %c2_i32_55 : i32
    %209 = tpu.assume_multiple %208, 2 : i32
    %210 = arith.index_cast %209 : i32 to index
    %c0_56 = arith.constant 0 : index
    %211 = vector.load %arg10[%210, %c0_56] : memref<16x128xf32, #tpu.memory_space<vmem>>, vector<2x128xf32>
    %cst_57 = arith.constant dense<0.000000e+00> : vector<2x128xf32>
    %212 = tpu.matmul %205, %7, %cst_57 {dimension_numbers = #tpu.dot_dimension_numbers<[1], [0], [0], [1], [0, 0, 1, 1], [], []>} : vector<2x32xf32>, vector<32x128xf32>, vector<2x128xf32> -> vector<2x128xf32>
    %213 = arith.addf %211, %212 : vector<2x128xf32>
    %214 = vector.extract_strided_slice %213 {offsets = [0, 0], sizes = [2, 32], strides = [1, 1]} : vector<2x128xf32> to vector<2x32xf32>
    %215 = arith.negf %214 : vector<2x32xf32>
    %216 = math.exp %215 : vector<2x32xf32>
    %cst_58 = arith.constant 1.000000e+00 : f32
    %217 = vector.broadcast %cst_58 : f32 to vector<2x32xf32>
    %218 = arith.addf %217, %216 : vector<2x32xf32>
    %219 = arith.divf %217, %218 : vector<2x32xf32>
    %220 = vector.extract_strided_slice %213 {offsets = [0, 32], sizes = [2, 32], strides = [1, 1]} : vector<2x128xf32> to vector<2x32xf32>
    %221 = arith.negf %220 : vector<2x32xf32>
    %222 = math.exp %221 : vector<2x32xf32>
    %cst_59 = arith.constant 1.000000e+00 : f32
    %223 = vector.broadcast %cst_59 : f32 to vector<2x32xf32>
    %224 = arith.addf %223, %222 : vector<2x32xf32>
    %225 = arith.divf %223, %224 : vector<2x32xf32>
    %226 = vector.extract_strided_slice %213 {offsets = [0, 64], sizes = [2, 32], strides = [1, 1]} : vector<2x128xf32> to vector<2x32xf32>
    %227 = math.tanh %226 : vector<2x32xf32>
    %228 = vector.extract_strided_slice %213 {offsets = [0, 96], sizes = [2, 32], strides = [1, 1]} : vector<2x128xf32> to vector<2x32xf32>
    %229 = arith.negf %228 : vector<2x32xf32>
    %230 = math.exp %229 : vector<2x32xf32>
    %cst_60 = arith.constant 1.000000e+00 : f32
    %231 = vector.broadcast %cst_60 : f32 to vector<2x32xf32>
    %232 = arith.addf %231, %230 : vector<2x32xf32>
    %233 = arith.divf %231, %232 : vector<2x32xf32>
    %234 = arith.mulf %225, %203 : vector<2x32xf32>
    %235 = arith.mulf %219, %227 : vector<2x32xf32>
    %236 = arith.addf %234, %235 : vector<2x32xf32>
    %237 = math.tanh %236 : vector<2x32xf32>
    %238 = arith.mulf %233, %237 : vector<2x32xf32>
    %239 = arith.index_cast %209 : i32 to index
    %c0_61 = arith.constant 0 : index
    %240 = vector.load %arg11[%239, %c0_61] : memref<16x32xf32, #tpu.memory_space<vmem>>, vector<2x32xf32>
    tpu.vector_store %arg11[%239, %c0_61], %238 {strides = array<i32>} : memref<16x32xf32, #tpu.memory_space<vmem>>, vector<2x32xf32>,
    %c7_i32 = arith.constant 7 : i32
    %c2_i32_62 = arith.constant 2 : i32
    %241 = arith.muli %c7_i32, %c2_i32_62 : i32
    %242 = tpu.assume_multiple %241, 2 : i32
    %243 = arith.index_cast %242 : i32 to index
    %c0_63 = arith.constant 0 : index
    %244 = vector.load %arg10[%243, %c0_63] : memref<16x128xf32, #tpu.memory_space<vmem>>, vector<2x128xf32>
    %cst_64 = arith.constant dense<0.000000e+00> : vector<2x128xf32>
    %245 = tpu.matmul %238, %7, %cst_64 {dimension_numbers = #tpu.dot_dimension_numbers<[1], [0], [0], [1], [0, 0, 1, 1], [], []>} : vector<2x32xf32>, vector<32x128xf32>, vector<2x128xf32> -> vector<2x128xf32>
    %246 = arith.addf %244, %245 : vector<2x128xf32>
    %247 = vector.extract_strided_slice %246 {offsets = [0, 0], sizes = [2, 32], strides = [1, 1]} : vector<2x128xf32> to vector<2x32xf32>
    %248 = arith.negf %247 : vector<2x32xf32>
    %249 = math.exp %248 : vector<2x32xf32>
    %cst_65 = arith.constant 1.000000e+00 : f32
    %250 = vector.broadcast %cst_65 : f32 to vector<2x32xf32>
    %251 = arith.addf %250, %249 : vector<2x32xf32>
    %252 = arith.divf %250, %251 : vector<2x32xf32>
    %253 = vector.extract_strided_slice %246 {offsets = [0, 32], sizes = [2, 32], strides = [1, 1]} : vector<2x128xf32> to vector<2x32xf32>
    %254 = arith.negf %253 : vector<2x32xf32>
    %255 = math.exp %254 : vector<2x32xf32>
    %cst_66 = arith.constant 1.000000e+00 : f32
    %256 = vector.broadcast %cst_66 : f32 to vector<2x32xf32>
    %257 = arith.addf %256, %255 : vector<2x32xf32>
    %258 = arith.divf %256, %257 : vector<2x32xf32>
    %259 = vector.extract_strided_slice %246 {offsets = [0, 64], sizes = [2, 32], strides = [1, 1]} : vector<2x128xf32> to vector<2x32xf32>
    %260 = math.tanh %259 : vector<2x32xf32>
    %261 = vector.extract_strided_slice %246 {offsets = [0, 96], sizes = [2, 32], strides = [1, 1]} : vector<2x128xf32> to vector<2x32xf32>
    %262 = arith.negf %261 : vector<2x32xf32>
    %263 = math.exp %262 : vector<2x32xf32>
    %cst_67 = arith.constant 1.000000e+00 : f32
    %264 = vector.broadcast %cst_67 : f32 to vector<2x32xf32>
    %265 = arith.addf %264, %263 : vector<2x32xf32>
    %266 = arith.divf %264, %265 : vector<2x32xf32>
    %267 = arith.mulf %258, %236 : vector<2x32xf32>
    %268 = arith.mulf %252, %260 : vector<2x32xf32>
    %269 = arith.addf %267, %268 : vector<2x32xf32>
    %270 = math.tanh %269 : vector<2x32xf32>
    %271 = arith.mulf %266, %270 : vector<2x32xf32>
    %272 = arith.index_cast %242 : i32 to index
    %c0_68 = arith.constant 0 : index
    %273 = vector.load %arg11[%272, %c0_68] : memref<16x32xf32, #tpu.memory_space<vmem>>, vector<2x32xf32>
    tpu.vector_store %arg11[%272, %c0_68], %271 {strides = array<i32>} : memref<16x32xf32, #tpu.memory_space<vmem>>, vector<2x32xf32>,
    %c8_i32 = arith.constant 8 : i32
    %c0_69 = arith.constant 0 : index
    %c0_70 = arith.constant 0 : index
    %274 = vector.load %arg11[%c0_69, %c0_70] : memref<16x32xf32, #tpu.memory_space<vmem>>, vector<16x32xf32>
    %c0_71 = arith.constant 0 : index
    %c0_72 = arith.constant 0 : index
    %275 = vector.load %arg6[%c0_71, %c0_72] : memref<32x4xf32, #tpu.memory_space<vmem>>, vector<32x4xf32>
    %cst_73 = arith.constant dense<0.000000e+00> : vector<16x4xf32>
    %276 = tpu.matmul %274, %275, %cst_73 {dimension_numbers = #tpu.dot_dimension_numbers<[1], [0], [0], [1], [0, 0, 1, 1], [], []>} : vector<16x32xf32>, vector<32x4xf32>, vector<16x4xf32> -> vector<16x4xf32>
    %c0_74 = arith.constant 0 : index
    %c0_75 = arith.constant 0 : index
    %277 = vector.load %arg7[%c0_74, %c0_75] : memref<16x4xf32, #tpu.memory_space<vmem>>, vector<16x4xf32>
    tpu.vector_store %arg7[%c0_74, %c0_75], %276 {strides = array<i32>} : memref<16x4xf32, #tpu.memory_space<vmem>>, vector<16x4xf32>,
    %c0_76 = arith.constant 0 : index
    %c0_77 = arith.constant 0 : index
    %278 = vector.load %arg8[%c0_76, %c0_77] : memref<2x32xf32, #tpu.memory_space<vmem>>, vector<2x32xf32>
    tpu.vector_store %arg8[%c0_76, %c0_77], %271 {strides = array<i32>} : memref<2x32xf32, #tpu.memory_space<vmem>>, vector<2x32xf32>,
    %c0_78 = arith.constant 0 : index
    %c0_79 = arith.constant 0 : index
    %279 = vector.load %arg9[%c0_78, %c0_79] : memref<2x32xf32, #tpu.memory_space<vmem>>, vector<2x32xf32>
    tpu.vector_store %arg9[%c0_78, %c0_79], %269 {strides = array<i32>} : memref<2x32xf32, #tpu.memory_space<vmem>>, vector<2x32xf32>,
    return
  }
}

</mosaic_0001>

<bundles_post_ra>
// kernel: tpu_custom_call.1
= control target key start
LH: loop header
LB: loop body
LE: loop exit
PB: predicated region body
PF: predicated region fallthrough
CT: control target
= control target key end

     0   :  { %15 = vsyncpa [#allocation5], 0  ;;  %vm48_vm0 = vcmask 1043456   ;;  %vm41_vm1 = vcmask 31744   ;;  %v1458_v6 = vmov 0.0|0.0   ;;  %s1697_s0 = inlined_call_operand.vmem [shape: f32[16,4], index: 0, kind: input, shape index: {}]   ;;  %s1698_s1 = inlined_call_operand.vmem [shape: f32[2,32], index: 1, kind: input, shape index: {}]   ;;  %s1699_s2 = inlined_call_operand.vmem [shape: f32[2,32], index: 2, kind: input, shape index: {}]   ;;  %s1700_s3 = inlined_call_operand.vmem [shape: f32[4,128], index: 3, kind: input, shape index: {}]   ;;  %s1701_s4 = inlined_call_operand.vmem [shape: f32[32,128], index: 4, kind: input, shape index: {}]   ;;  %s1702_s5 = inlined_call_operand.vmem [shape: f32[1,128], index: 5, kind: input, shape index: {}]   ;;  %s1703_s6 = inlined_call_operand.vmem [shape: f32[32,4], index: 6, kind: input, shape index: {}]   ;;  %s1704_s7 = inlined_call_operand.vmem [shape: f32[16,4], index: 7, kind: output, shape index: {0}]   ;;  %s1705_s8 = inlined_call_operand.hbm [shape: f32[2,32], index: 8, kind: output, shape index: {1}]   ;;  %s1706_s9 = inlined_call_operand.hbm [shape: f32[2,32], index: 9, kind: output, shape index: {2}]  }
   0x1   :  { %v33_v0 = vld [vmem:[%s1700_s3] sm:$0xf]  ;;  %v32_v2 = vld [vmem:[%s1697_s0 + $0x8] sm:$0xff]  ;;  %v131_v5 = vld [vmem:[%s1701_s4 + $0x10] sm:$0xff]  ;;  %1282 = vmatprep.subr.bf16.mxu1 %v1458_v6 }
   0x2   :  { %v31_v1 = vld [vmem:[%s1697_s0] sm:$0xff]  ;;  %1178 = vmatprep.subr.msk.mxu0 %vm48_vm0, %v33_v0  ;;  %v130_v4 = vld [vmem:[%s1701_s4 + $0x8] sm:$0xff]  ;;  %v132_v8 = vld [vmem:[%s1701_s4 + $0x18] sm:$0xff] }
   0x3   :  { %1180 = vmatprep.mubr.msk.f32.mxu0 %vm41_vm1, %v31_v1  ;;  %v129_v3 = vld [vmem:[%s1701_s4] sm:$0xff]  ;;  %1179 = vmatpush3.msk.msra.mxu0 %vm48_vm0, %v33_v0 }
   0x4   :  { %v1536_v7 = vpack.c.bf16 %v130_v4, %v129_v3 }
   0x5   :  { %16 = vsyncpa [#allocation7], 0  ;;  %1181 = vmatmul.mubr.msk.f32.vlgmr.msra.gmra.mrb[0].mxu0 %vm41_vm1, %v32_v2  ;;  %vm1459_vm2 = vmmov 0   ;;  %v1460_v9 = vmov 0.0   ;;  %v1545_v10 = vpack.c.bf16 %v132_v8, %v131_v5  ;;  %1288 = vmatprep.subr.bf16.mxu0 %v1458_v6  ;;  %v133_v11 = vld [vmem:[%s1698_s1] sm:$0x3] }
   0x6   :  { %1191 = vmatprep.mubr.msk.f32.mxu1 %vm1459_vm2, %v1460_v9  ;;  %1284 = vmatpush3.bf16.msra.mxu1 %v1536_v7  ;;  %vm136_vm3 = vcmask 261120   ;;  %v1107_v12 = vld [vmem:[%s1702_s5] ss:$0 sm:$0xff]  ;;  %s1461_s23 = smov 64   ;;  %s1462_s5 = smov 32   ;;  %vm243_vm4 = vcmask 254976  }
   0x7   :  { %1285 = vmatprep.subr.bf16.mxu1 %v1458_v6  ;;  %1290 = vmatpush3.bf16.msra.mxu0 %v1536_v7  ;;  %v134_v22 = vld [vmem:[%s1699_s2] sm:$0x3]  ;;  %s1463_s2 = smov 96   ;;  %s1465_s14 = smov [#allocation6]  }
   0x8   :  { %1291 = vmatprep.subr.bf16.mxu0 %v1458_v6  ;;  %1202 = vmatprep.mubr.msk.f32.mxu0 %vm1459_vm2, %v1460_v9  ;;  %s1093_s15 = sshll.u32 %s1465_s14, 4  ;;  %s1094_s15 = int_to_ptr.vmem [resolvable:$true] %s1093_s15 }
   0xa   :  { %1287 = vmatpush3.bf16.msra.mxu1 %v1545_v10 }
   0xb   :  { %1293 = vmatpush3.bf16.msra.mxu0 %v1545_v10  ;;  %1294 = vmatprep.subr.bf16.mxu1 %v1458_v6 }
   0xc   :  { %1300 = vmatprep.subr.bf16.mxu0 %v1458_v6 }
   0xd   :  { %1192 = vmatmul.mubr.msk.f32.vlgmr.msra.gmra.mrb[0].mxu1 %vm136_vm3, %v133_v11 }
   0xe   :  { %1296 = vmatpush3.bf16.msra.mxu1 %v1536_v7  ;;  %1213 = vmatprep.mubr.msk.f32.mxu1 %vm1459_vm2, %v1460_v9 }
   0xf   :  { %1297 = vmatprep.subr.bf16.mxu1 %v1458_v6 }
  0x12   :  { %1299 = vmatpush3.bf16.msra.mxu1 %v1545_v10 }
  0x13   :  { %1306 = vmatprep.subr.bf16.mxu1 %v1458_v6 }
  0xd8   :  { %v1182_v13 = vpop.f32.mrb[0].mxu0 }
  0xd9   :  { %v124_v14 = vadd.f32 %v1182_v13, %v1107_v12  ;;  %v118_v15 = vpop.f32.mrb[1].mxu0 }
  0xda   :  { %v119_v16 = vadd.f32 %v1107_v12, %v118_v15 }
  0xdb   :  { %128 = vst [vmem:[#allocation2 + $0x8] sm:$0xff] %v124_v14 }
  0xdc   :  { %127 = vst [vmem:[#allocation2] sm:$0xff] %v119_v16 }
  0xe0   :  { %v206_v17 = vpop.f32.mrb[0].mxu1 }
  0xe1   :  { %v1193_v18 = vpop.f32.mrb[1].mxu1 }
  0xe3   :  { %v135_v19 = vld [vmem:[#allocation2] sm:$0x3]  ;;  %v246_v37 = vld [vmem:[#allocation2 + $0x2] sm:$0x3]  ;;  %v351_v55 = vld [vmem:[#allocation2 + $0x4] sm:$0x3] }
  0xe4   :  { %v210_v20 = vadd.f32 %v206_v17, %v135_v19  ;;  %v456_v13 = vld [vmem:[#allocation2 + $0x6] sm:$0x3] }
  0xe6   :  { %1346 = vtanh.f32 %v210_v20  ;;  %v1112_v23 = vmul.f32 -1.442695, %v210_v20 }
  0xe8   :  { %1348 = vpow2.f32 %v1112_v23 }
  0xf0   :  { %v1347_v21 = vpop.eup %1346 }
  0xf1   :  { %224 = vrot.lane.b32.xlu0 %v1347_v21, %s1461_s23 }
  0xf2   :  { %v1349_v24 = vpop.eup %1348 }
  0xf3   :  { %v214_v25 = vadd.f32 1.0, %v1349_v24 }
  0xf5   :  { %219 = vrot.lane.b32.xlu0 %v134_v22, %s1462_s5  ;;  %1350 = vrcp.f32 %v214_v25 }
  0xff   :  { %v1351_v26 = vpop.eup %1350 }
 0x163   :  { %v225_v27 = vpop.permute.xlu0 %224 }
 0x164   :  { %v227_v28 = vmul.f32 %v1351_v26, %v225_v27 }
 0x166   :  { %229 = vrot.lane.b32.xlu1 %v227_v28, %s1462_s5 }
 0x167   :  { %v220_v29 = vpop.permute.xlu0 %219 }
 0x168   :  { %v222_v30 = vmul.f32 %v1351_v26, %v220_v29 }
 0x1d8   :  { %v230_v31 = vpop.permute.xlu1 %229 }
 0x1d9   :  { %v232_v32 = vadd.f32 %v230_v31, %v222_v30  ;;  %v561_v31 = vld [vmem:[#allocation2 + $0x8] sm:$0x3] }
 0x1db   :  { %1352 = vtanh.f32 %v232_v32 }
 0x1e5   :  { %v1353_v33 = vpop.eup %1352 }
 0x1e6   :  { %235 = vrot.lane.b32.xlu1 %v1353_v33, %s1461_s23 }
 0x258   :  { %v236_v34 = vpop.permute.xlu1 %235 }
 0x259   :  { %v238_v35 = vmul.f32 %v1351_v26, %v236_v34 }
 0x25b   :  { %240 = vrot.lane.b32.xlu0 %v238_v35, %s1462_s5 }
 0x2cd   :  { %v241_v36 = vpop.permute.xlu0 %240 }
 0x2ce   :  { %244 = vst.msk [vmem:[#allocation3] sm:$0x3] %vm243_vm4, %v241_v36  ;;  %1203 = vmatmul.mubr.msk.f32.vlgmr.msra.gmra.mrb[2].mxu0 %vm136_vm3, %v241_v36 }
 0x2cf   :  { %1302 = vmatpush3.bf16.msra.mxu0 %v1536_v7  ;;  %1224 = vmatprep.mubr.msk.f32.mxu0 %vm1459_vm2, %v1460_v9 }
 0x2d0   :  { %1303 = vmatprep.subr.bf16.mxu0 %v1458_v6 }
 0x2d3   :  { %1305 = vmatpush3.bf16.msra.mxu0 %v1545_v10 }
 0x2d4   :  { %1312 = vmatprep.subr.bf16.mxu0 %v1458_v6 }
 0x3a1   :  { %v315_v38 = vpop.f32.mrb[2].mxu0 }
 0x3a2   :  { %v319_v39 = vadd.f32 %v315_v38, %v246_v37  ;;  %v1204_v40 = vpop.f32.mrb[3].mxu0 }
 0x3a4   :  { %1354 = vtanh.f32 %v319_v39  ;;  %v1114_v42 = vmul.f32 -1.442695, %v319_v39 }
 0x3a6   :  { %1356 = vpow2.f32 %v1114_v42 }
 0x3ae   :  { %v1355_v41 = vpop.eup %1354 }
 0x3af   :  { %329 = vrot.lane.b32.xlu1 %v1355_v41, %s1461_s23 }
 0x3b0   :  { %v1357_v43 = vpop.eup %1356 }
 0x3b1   :  { %v323_v44 = vadd.f32 1.0, %v1357_v43 }
 0x3b3   :  { %1358 = vrcp.f32 %v323_v44 }
 0x3bd   :  { %v1359_v45 = vpop.eup %1358 }
 0x3be   :  { %v327_v48 = vmul.f32 %v1359_v45, %v232_v32 }
 0x421   :  { %v330_v46 = vpop.permute.xlu1 %329 }
 0x422   :  { %v332_v47 = vmul.f32 %v1359_v45, %v330_v46 }
 0x424   :  { %334 = vrot.lane.b32.xlu0 %v332_v47, %s1462_s5 }
 0x496   :  { %v335_v49 = vpop.permute.xlu0 %334 }
 0x497   :  { %v337_v50 = vadd.f32 %v335_v49, %v327_v48  ;;  %v666_v49 = vld [vmem:[#allocation2 + $0xa] sm:$0x3] }
 0x499   :  { %1360 = vtanh.f32 %v337_v50 }
 0x4a3   :  { %v1361_v51 = vpop.eup %1360 }
 0x4a4   :  { %340 = vrot.lane.b32.xlu1 %v1361_v51, %s1461_s23 }
 0x516   :  { %v341_v52 = vpop.permute.xlu1 %340 }
 0x517   :  { %v343_v53 = vmul.f32 %v1359_v45, %v341_v52 }
 0x519   :  { %345 = vrot.lane.b32.xlu0 %v343_v53, %s1462_s5 }
 0x58b   :  { %v346_v54 = vpop.permute.xlu0 %345 }
 0x58c   :  { %349 = vst.msk [vmem:[#allocation3 + $0x2] sm:$0x3] %vm243_vm4, %v346_v54  ;;  %1214 = vmatmul.mubr.msk.f32.vlgmr.msra.gmra.mrb[2].mxu1 %vm136_vm3, %v346_v54 }
 0x58d   :  { %1308 = vmatpush3.bf16.msra.mxu1 %v1536_v7  ;;  %1235 = vmatprep.mubr.msk.f32.mxu1 %vm1459_vm2, %v1460_v9 }
 0x58e   :  { %1309 = vmatprep.subr.bf16.mxu1 %v1458_v6 }
 0x591   :  { %1311 = vmatpush3.bf16.msra.mxu1 %v1545_v10 }
 0x592   :  { %1318 = vmatprep.subr.bf16.mxu1 %v1458_v6 }
 0x65f   :  { %v420_v56 = vpop.f32.mrb[2].mxu1 }
 0x660   :  { %v424_v57 = vadd.f32 %v420_v56, %v351_v55  ;;  %v1215_v58 = vpop.f32.mrb[3].mxu1 }
 0x662   :  { %1362 = vtanh.f32 %v424_v57  ;;  %v1116_v60 = vmul.f32 -1.442695, %v424_v57 }
 0x664   :  { %1364 = vpow2.f32 %v1116_v60 }
 0x66c   :  { %v1363_v59 = vpop.eup %1362 }
 0x66d   :  { %434 = vrot.lane.b32.xlu1 %v1363_v59, %s1461_s23 }
 0x66e   :  { %v1365_v61 = vpop.eup %1364 }
 0x66f   :  { %v428_v62 = vadd.f32 1.0, %v1365_v61 }
 0x671   :  { %1366 = vrcp.f32 %v428_v62 }
 0x67b   :  { %v1367_v63 = vpop.eup %1366 }
 0x67c   :  { %v432_v2 = vmul.f32 %v1367_v63, %v337_v50 }
 0x6df   :  { %v435_v0 = vpop.permute.xlu1 %434 }
 0x6e0   :  { %v437_v1 = vmul.f32 %v1367_v63, %v435_v0  ;;  %v771_v0 = vld [vmem:[#allocation2 + $0xc] sm:$0x3] }
 0x6e2   :  { %439 = vrot.lane.b32.xlu0 %v437_v1, %s1462_s5 }
 0x754   :  { %v440_v3 = vpop.permute.xlu0 %439 }
 0x755   :  { %v442_v4 = vadd.f32 %v440_v3, %v432_v2 }
 0x757   :  { %1368 = vtanh.f32 %v442_v4 }
 0x761   :  { %v1369_v5 = vpop.eup %1368 }
 0x762   :  { %445 = vrot.lane.b32.xlu1 %v1369_v5, %s1461_s23 }
 0x7d4   :  { %v446_v8 = vpop.permute.xlu1 %445 }
 0x7d5   :  { %v448_v11 = vmul.f32 %v1367_v63, %v446_v8 }
 0x7d7   :  { %450 = vrot.lane.b32.xlu0 %v448_v11, %s1462_s5 }
 0x849   :  { %v451_v12 = vpop.permute.xlu0 %450 }
 0x84a   :  { %454 = vst.msk [vmem:[#allocation3 + $0x4] sm:$0x3] %vm243_vm4, %v451_v12  ;;  %1225 = vmatmul.mubr.msk.f32.vlgmr.msra.gmra.mrb[4].mxu0 %vm136_vm3, %v451_v12 }
 0x84b   :  { %1314 = vmatpush3.bf16.msra.mxu0 %v1536_v7  ;;  %1246 = vmatprep.mubr.msk.f32.mxu0 %vm1459_vm2, %v1460_v9 }
 0x84c   :  { %1315 = vmatprep.subr.bf16.mxu0 %v1458_v6 }
 0x84f   :  { %1317 = vmatpush3.bf16.msra.mxu0 %v1545_v10 }
 0x850   :  { %1324 = vmatprep.subr.bf16.mxu0 %v1458_v6 }
 0x91d   :  { %v525_v14 = vpop.f32.mrb[4].mxu0 }
 0x91e   :  { %v529_v15 = vadd.f32 %v525_v14, %v456_v13  ;;  %v1226_v16 = vpop.f32.mrb[5].mxu0 }
 0x920   :  { %1370 = vtanh.f32 %v529_v15  ;;  %v1118_v18 = vmul.f32 -1.442695, %v529_v15 }
 0x922   :  { %1372 = vpow2.f32 %v1118_v18 }
 0x92a   :  { %v1371_v17 = vpop.eup %1370 }
 0x92b   :  { %539 = vrot.lane.b32.xlu1 %v1371_v17, %s1461_s23 }
 0x92c   :  { %v1373_v19 = vpop.eup %1372 }
 0x92d   :  { %v533_v20 = vadd.f32 1.0, %v1373_v19 }
 0x92f   :  { %1374 = vrcp.f32 %v533_v20 }
 0x939   :  { %v1375_v21 = vpop.eup %1374 }
 0x93a   :  { %v537_v24 = vmul.f32 %v1375_v21, %v442_v4 }
 0x99d   :  { %v540_v22 = vpop.permute.xlu1 %539 }
 0x99e   :  { %v542_v23 = vmul.f32 %v1375_v21, %v540_v22  ;;  %v876_v22 = vld [vmem:[#allocation2 + $0xe] sm:$0x3] }
 0x9a0   :  { %544 = vrot.lane.b32.xlu0 %v542_v23, %s1462_s5 }
 0xa12   :  { %v545_v25 = vpop.permute.xlu0 %544 }
 0xa13   :  { %v547_v26 = vadd.f32 %v545_v25, %v537_v24 }
 0xa15   :  { %1376 = vtanh.f32 %v547_v26 }
 0xa1f   :  { %v1377_v27 = vpop.eup %1376 }
 0xa20   :  { %550 = vrot.lane.b32.xlu1 %v1377_v27, %s1461_s23 }
 0xa92   :  { %v551_v28 = vpop.permute.xlu1 %550 }
 0xa93   :  { %v553_v29 = vmul.f32 %v1375_v21, %v551_v28 }
 0xa95   :  { %555 = vrot.lane.b32.xlu0 %v553_v29, %s1462_s5 }
 0xb07   :  { %v556_v30 = vpop.permute.xlu0 %555 }
 0xb08   :  { %559 = vst.msk [vmem:[#allocation3 + $0x6] sm:$0x3] %vm243_vm4, %v556_v30  ;;  %1236 = vmatmul.mubr.msk.f32.vlgmr.msra.gmra.mrb[4].mxu1 %vm136_vm3, %v556_v30 }
 0xb09   :  { %1320 = vmatpush3.bf16.msra.mxu1 %v1536_v7  ;;  %1257 = vmatprep.mubr.msk.f32.mxu1 %vm1459_vm2, %v1460_v9 }
 0xb0a   :  { %1321 = vmatprep.subr.bf16.mxu1 %v1458_v6 }
 0xb0d   :  { %1323 = vmatpush3.bf16.msra.mxu1 %v1545_v10 }
 0xb0f   :  { %v980_v63 = vld [vmem:[#allocation3] sm:$0xff] }
 0xbdb   :  { %v630_v32 = vpop.f32.mrb[4].mxu1 }
 0xbdc   :  { %v634_v33 = vadd.f32 %v630_v32, %v561_v31  ;;  %v1237_v34 = vpop.f32.mrb[5].mxu1 }
 0xbde   :  { %1378 = vtanh.f32 %v634_v33  ;;  %v1120_v36 = vmul.f32 -1.442695, %v634_v33 }
 0xbe0   :  { %1380 = vpow2.f32 %v1120_v36 }
 0xbe8   :  { %v1379_v35 = vpop.eup %1378 }
 0xbe9   :  { %644 = vrot.lane.b32.xlu1 %v1379_v35, %s1461_s23 }
 0xbea   :  { %v1381_v37 = vpop.eup %1380 }
 0xbeb   :  { %v638_v38 = vadd.f32 1.0, %v1381_v37  ;;  %v982_v37 = vld [vmem:[%s1703_s6] sm:$0xff] }
 0xbed   :  { %1382 = vrcp.f32 %v638_v38  ;;  %v983_v38 = vld [vmem:[%s1703_s6 + $0x8] sm:$0xff] }
 0xbf7   :  { %v1383_v39 = vpop.eup %1382 }
 0xbf8   :  { %v642_v42 = vmul.f32 %v1383_v39, %v547_v26 }
 0xc5b   :  { %v645_v40 = vpop.permute.xlu1 %644 }
 0xc5c   :  { %v647_v41 = vmul.f32 %v1383_v39, %v645_v40  ;;  %v984_v40 = vld [vmem:[%s1703_s6 + $0x10] sm:$0xff] }
 0xc5e   :  { %649 = vrot.lane.b32.xlu0 %v647_v41, %s1462_s5  ;;  %v985_v41 = vld [vmem:[%s1703_s6 + $0x18] sm:$0xff]  ;;  %s1464_s6 = smov [#allocation4]  }
 0xc5f   :  { %s1083_s13 = sshll.u32 %s1464_s6, 4  ;;  %s1084_s13 = int_to_ptr.vmem [resolvable:$true] %s1083_s13 }
 0xc60   :  { %s1410_s16 = scalar_lea.vmem %s1084_s13, 32  ;;  %p1415_p1 = scmp.lt.s32.totalorder %s1084_s13, %s1084_s13 }
 0xc61   :  { %p1411_p0 = scmp.ne.s32.totalorder %s1084_s13, %s1410_s16  ;;  %p1416_p2 = scmp.lt.s32.totalorder %s1410_s16, %s1410_s16 }
 0xc63   :  { %p1417_p3 = por %p1416_p2, %p1415_p1 }
 0xc65   :  { %p1418_p4 = pnand %p1417_p3, %p1411_p0 }
 0xcd0   :  { %v650_v43 = vpop.permute.xlu0 %649 }
 0xcd1   :  { %v652_v44 = vadd.f32 %v650_v43, %v642_v42  ;;  %v1334_v42 = vpack.c.bf16 %v985_v41, %v984_v40 }
 0xcd3   :  { %1384 = vtanh.f32 %v652_v44 }
 0xcdd   :  { %v1385_v45 = vpop.eup %1384 }
 0xcde   :  { %655 = vrot.lane.b32.xlu1 %v1385_v45, %s1461_s23 }
 0xd50   :  { %v656_v46 = vpop.permute.xlu1 %655 }
 0xd51   :  { %v658_v47 = vmul.f32 %v1383_v39, %v656_v46  ;;  %v1330_v39 = vpack.c.bf16 %v983_v38, %v982_v37 }
 0xd53   :  { %660 = vrot.lane.b32.xlu0 %v658_v47, %s1462_s5  ;;  %1331 = vmatprep.subr.bf16.mxu1 %v1330_v39 }
 0xdc5   :  { %v661_v48 = vpop.permute.xlu0 %660 }
 0xdc6   :  { %664 = vst.msk [vmem:[#allocation3 + $0x8] sm:$0x3] %vm243_vm4, %v661_v48  ;;  %1247 = vmatmul.mubr.msk.f32.vlgmr.msra.gmra.mrb[6].mxu0 %vm136_vm3, %v661_v48 }
 0xdc7   :  { %1326 = vmatpush3.bf16.msra.mxu0 %v1536_v7  ;;  %1268 = vmatprep.mubr.msk.f32.mxu0 %vm1459_vm2, %v1460_v9 }
 0xdc8   :  { %1327 = vmatprep.subr.bf16.mxu0 %v1458_v6 }
 0xdcb   :  { %1329 = vmatpush3.bf16.msra.mxu0 %v1545_v10 }
 0xe99   :  { %v735_v50 = vpop.f32.mrb[6].mxu0 }
 0xe9a   :  { %v739_v51 = vadd.f32 %v735_v50, %v666_v49  ;;  %v1248_v52 = vpop.f32.mrb[7].mxu0 }
 0xe9c   :  { %1386 = vtanh.f32 %v739_v51  ;;  %v1122_v54 = vmul.f32 -1.442695, %v739_v51 }
 0xe9e   :  { %1388 = vpow2.f32 %v1122_v54 }
 0xea6   :  { %v1387_v53 = vpop.eup %1386 }
 0xea7   :  { %749 = vrot.lane.b32.xlu1 %v1387_v53, %s1461_s23 }
 0xea8   :  { %v1389_v55 = vpop.eup %1388 }
 0xea9   :  { %v743_v56 = vadd.f32 1.0, %v1389_v55 }
 0xeab   :  { %1390 = vrcp.f32 %v743_v56 }
 0xeb5   :  { %v1391_v7 = vpop.eup %1390 }
 0xeb6   :  { %v747_v6 = vmul.f32 %v1391_v7, %v652_v44 }
 0xf19   :  { %v750_v57 = vpop.permute.xlu1 %749 }
 0xf1a   :  { %v752_v9 = vmul.f32 %v1391_v7, %v750_v57 }
 0xf1c   :  { %754 = vrot.lane.b32.xlu0 %v752_v9, %s1462_s5 }
 0xf8e   :  { %v755_v10 = vpop.permute.xlu0 %754 }
 0xf8f   :  { %v757_v58 = vadd.f32 %v755_v10, %v747_v6 }
 0xf91   :  { %1392 = vtanh.f32 %v757_v58 }
 0xf9b   :  { %v1393_v59 = vpop.eup %1392 }
 0xf9c   :  { %760 = vrot.lane.b32.xlu1 %v1393_v59, %s1461_s23 }
0x100e   :  { %v761_v60 = vpop.permute.xlu1 %760 }
0x100f   :  { %v763_v61 = vmul.f32 %v1391_v7, %v761_v60 }
0x1011   :  { %765 = vrot.lane.b32.xlu0 %v763_v61, %s1462_s5 }
0x1083   :  { %v766_v62 = vpop.permute.xlu0 %765 }
0x1084   :  { %769 = vst.msk [vmem:[#allocation3 + $0xa] sm:$0x3] %vm243_vm4, %v766_v62  ;;  %1258 = vmatmul.mubr.msk.f32.vlgmr.msra.gmra.mrb[6].mxu1 %vm136_vm3, %v766_v62 }
0x1085   :  { %1279 = vmatprep.mubr.msk.f32.mxu1 %vm136_vm3, %v980_v63  ;;  %1333 = vmatpush3.bf16.msra.mxu1 %v1330_v39 }
0x1086   :  { %1335 = vmatprep.subr.bf16.mxu1 %v1334_v42 }
0x1089   :  { %1337 = vmatpush3.bf16.msra.mxu1 %v1334_v42 }
0x1157   :  { %v840_v1 = vpop.f32.mrb[6].mxu1 }
0x1158   :  { %v844_v2 = vadd.f32 %v840_v1, %v771_v0  ;;  %v1259_v3 = vpop.f32.mrb[7].mxu1 }
0x115a   :  { %1394 = vtanh.f32 %v844_v2  ;;  %v1124_v5 = vmul.f32 -1.442695, %v844_v2 }
0x115c   :  { %1396 = vpow2.f32 %v1124_v5 }
0x1164   :  { %v1395_v4 = vpop.eup %1394 }
0x1165   :  { %854 = vrot.lane.b32.xlu1 %v1395_v4, %s1461_s23 }
0x1166   :  { %v1397_v8 = vpop.eup %1396 }
0x1167   :  { %v848_v11 = vadd.f32 1.0, %v1397_v8 }
0x1169   :  { %1398 = vrcp.f32 %v848_v11 }
0x1173   :  { %v1399_v12 = vpop.eup %1398 }
0x1174   :  { %v852_v15 = vmul.f32 %v1399_v12, %v757_v58 }
0x11d7   :  { %v855_v13 = vpop.permute.xlu1 %854 }
0x11d8   :  { %v857_v14 = vmul.f32 %v1399_v12, %v855_v13 }
0x11da   :  { %859 = vrot.lane.b32.xlu0 %v857_v14, %s1462_s5 }
0x124c   :  { %v860_v16 = vpop.permute.xlu0 %859 }
0x124d   :  { %v862_v17 = vadd.f32 %v860_v16, %v852_v15 }
0x124f   :  { %1400 = vtanh.f32 %v862_v17 }
0x1259   :  { %v1401_v18 = vpop.eup %1400 }
0x125a   :  { %865 = vrot.lane.b32.xlu1 %v1401_v18, %s1461_s23 }
0x12cc   :  { %v866_v19 = vpop.permute.xlu1 %865 }
0x12cd   :  { %v868_v20 = vmul.f32 %v1399_v12, %v866_v19 }
0x12cf   :  { %870 = vrot.lane.b32.xlu0 %v868_v20, %s1462_s5 }
0x1341   :  { %v871_v21 = vpop.permute.xlu0 %870 }
0x1342   :  { %874 = vst.msk [vmem:[#allocation3 + $0xc] sm:$0x3] %vm243_vm4, %v871_v21  ;;  %1269 = vmatmul.mubr.msk.f32.vlgmr.msra.gmra.mrb[8].mxu0 %vm136_vm3, %v871_v21 }
0x1415   :  { %v945_v23 = vpop.f32.mrb[8].mxu0 }
0x1416   :  { %v949_v24 = vadd.f32 %v945_v23, %v876_v22  ;;  %v1270_v25 = vpop.f32.mrb[9].mxu0 }
0x1418   :  { %1402 = vtanh.f32 %v949_v24  ;;  %v1126_v27 = vmul.f32 -1.442695, %v949_v24 }
0x141a   :  { %1404 = vpow2.f32 %v1126_v27 }
0x1422   :  { %v1403_v26 = vpop.eup %1402 }
0x1423   :  { %959 = vrot.lane.b32.xlu1 %v1403_v26, %s1461_s23 }
0x1424   :  { %v1405_v28 = vpop.eup %1404 }
0x1425   :  { %v953_v29 = vadd.f32 1.0, %v1405_v28 }
0x1427   :  { %1406 = vrcp.f32 %v953_v29 }
0x1431   :  { %v1407_v30 = vpop.eup %1406 }
0x1432   :  { %v957_v33 = vmul.f32 %v1407_v30, %v862_v17 }
0x1495   :  { %v960_v31 = vpop.permute.xlu1 %959 }
0x1496   :  { %v962_v32 = vmul.f32 %v1407_v30, %v960_v31 }
0x1498   :  { %964 = vrot.lane.b32.xlu0 %v962_v32, %s1462_s5 }
0x150a   :  { %v965_v34 = vpop.permute.xlu0 %964 }
0x150b   :  { %v967_v35 = vadd.f32 %v965_v34, %v957_v33 }
0x150d   :  { %1408 = vtanh.f32 %v967_v35 }
0x1517   :  { %v1409_v36 = vpop.eup %1408 }
0x1518   :  { %970 = vrot.lane.b32.xlu1 %v1409_v36, %s1461_s23 }
0x151c   :  { %1071 = vrot.lane.b32.xlu1 %v967_v35, %s1463_s2 }
0x158a   :  { %v971_v43 = vpop.permute.xlu1 %970 }
0x158b   :  { %v973_v44 = vmul.f32 %v1407_v30, %v971_v43 }
0x158d   :  { %975 = vrot.lane.b32.xlu0 %v973_v44, %s1462_s5 }
0x158e   :  { %v1072_v45 = vpop.permute.xlu1 %1071 }
0x158f   :  { %1074 = vst.msk [vmem:[#allocation6] sm:$0x3] %vm243_vm4, %v1072_v45 }
0x15ff   :  { %v976_v46 = vpop.permute.xlu0 %975 }
0x1600   :  { %979 = vst.msk [vmem:[#allocation3 + $0xe] sm:$0x3] %vm243_vm4, %v976_v46  ;;  %1069 = vst.msk [vmem:[#allocation4] sm:$0x3] %vm243_vm4, %v976_v46 }
0x1607   :  { %v981_v47 = vld [vmem:[#allocation3 + $0x8] sm:$0xff] }
0x1608   :  { %1280 = vmatmul.mubr.msk.f32.vlgmr.msra.gmra.mrb[8].mxu1 %vm136_vm3, %v981_v47 }
0x1609   :  { %1421 = shalt.err (!%p1418_p4)
}
0x160a   :  { %s1422_s3 = scalar_lea.hbm %s1705_s8, 32 }
0x160b   :  { %p1423_p5 = scmp.ne.s32.totalorder %s1705_s8, %s1422_s3  ;;  %p1426_p6 = scmp.lt.u32.totalorder %s1422_s3, %s1705_s8 }
0x160d   :  { %p1428_p7 = pnand %p1426_p6, %p1423_p5 }
0x160f   :  { %1431 = shalt.err (!%p1428_p7)
}
0x1610   :  { %1086 = dma.vmem_to_hbm [thread:$0]  %s1084_s13, 32, %s1705_s8, [#allocation5]  }
0x1611   :  { %s1432_s22 = scalar_lea.vmem %s1094_s15, 32  ;;  %p1437_p9 = scmp.lt.s32.totalorder %s1094_s15, %s1094_s15 }
0x1612   :  { %p1433_p8 = scmp.ne.s32.totalorder %s1094_s15, %s1432_s22  ;;  %p1438_p10 = scmp.lt.s32.totalorder %s1432_s22, %s1432_s22 }
0x1614   :  { %p1439_p11 = por %p1438_p10, %p1437_p9 }
0x1616   :  { %p1440_p12 = pnand %p1439_p11, %p1433_p8 }
0x1618   :  { %1443 = shalt.err (!%p1440_p12)
}
0x1619   :  { %s1444_s25 = scalar_lea.hbm %s1706_s9, 32 }
0x161a   :  { %p1445_p13 = scmp.ne.s32.totalorder %s1706_s9, %s1444_s25  ;;  %p1448_p0 = scmp.lt.u32.totalorder %s1444_s25, %s1706_s9 }
0x161c   :  { %p1450_p1 = pnand %p1448_p0, %p1445_p13 }
0x161e   :  { %1453 = shalt.err (!%p1450_p1)
}
0x161f   :  { %1096 = dma.vmem_to_hbm [thread:$0]  %s1094_s15, 32, %s1706_s9, [#allocation7]  }
0x16db   :  { %v1281_v48 = vpop.f32.mrb[8].mxu1 }
0x16dc   :  { %1068 = vst.msk [vmem:[%s1704_s7 + $0x8] sm:$0xff] %vm41_vm1, %v1281_v48  ;;  %v1058_v49 = vpop.f32.mrb[9].mxu1 }
0x16dd   :  { %1067 = vst.msk [vmem:[%s1704_s7] sm:$0xff] %vm41_vm1, %v1058_v49 }
0x16de   :  { %1454 = dma.done.wait [#allocation5], 32  }
0x16df   :  { %1455 = vsyncadd [#allocation5], 4294967264 }
0x16e0   :  { %1456 = dma.done.wait [#allocation7], 32  }
0x16e1   :  { %1457 = vsyncadd [#allocation7], 4294967264 }
0x16e2   :  { %1105 = vsyncpa [#allocation5], 1 }
0x16e3   :  { %1106 = vsyncpa [#allocation7], 1 }

</bundles_post_ra>
